<compile_context>
chip_gen: v5e
topology: v5e:2x2
jax: 0.10.0
libtpu: 0.0.40
codegen_flags: <defaults>
</compile_context>

<pallas_src>
import functools

import jax
import jax.numpy as jnp
from jax.experimental import pallas as pl
from jax.experimental.pallas import tpu as pltpu

EPS = 1e-6          # RMSNorm epsilon (affine=False)
LANE = 128          # TPU lane width
SUBLANE = 8         # f32 sublane width
MIB = 1024 * 1024


def _round_up(x: int, m: int) -> int:
    return (x + m - 1) // m * m


def _round_down(x: int, m: int) -> int:
    return (x // m) * m


def _cdiv(a: int, b: int) -> int:
    return -(-a // b)


def _vmem_capacity_bytes() -> int:
    """Physical per-core VMEM; conservative fallback if the query fails."""
    try:
        return int(pltpu.get_tpu_info().vmem_capacity_bytes)
    except Exception:
        return 64 * MIB          # v7x per-TC size; v5e/v6e actually have 128 MiB


def _device_kind() -> str:
    try:
        return jax.devices()[0].device_kind.lower()
    except Exception:
        return ""


def _silu_dtype(weight_dtype):
    """bf16 SiLU on chips with bf16 VPU/EUP (v6e/v7x); f32 on v5e or f32 weights."""
    if jnp.dtype(weight_dtype) != jnp.dtype(jnp.bfloat16):
        return jnp.float32
    kind = _device_kind()
    if ("v5 lite" in kind) or ("v5e" in kind) or ("v5lite" in kind):
        return jnp.float32
    return jnp.bfloat16


def _largest_lane_divisor(mlp_p: int, tk_desired: int) -> int:
    """Largest multiple of LANE that divides mlp_p and is <= tk_desired."""
    m = mlp_p // LANE
    best = 1
    d = 1
    while d * d <= m:
        if m % d == 0:
            for c in (d, m // d):
                if c * LANE <= tk_desired and c > best:
                    best = c
        d += 1
    return best * LANE


# ----------------------------------------------------------------------------
# Kernels
# ----------------------------------------------------------------------------
def _mlp_fused_kernel(x_ref, wk_ref, wv_ref, scale_ref, o_ref, *, inv_dim, silu_dtype):
    # x_ref: (tm, dim_p) tile of tokens (feature axis possibly zero-padded).
    x = x_ref[...].astype(jnp.float32)

    # RMSNorm (no affine), f32 stats. sum * (1/true_dim) keeps zero feature
    # padding from perturbing the mean-square statistic.
    ms = jnp.sum(x * x, axis=-1, keepdims=True) * inv_dim
    xn = x * jax.lax.rsqrt(ms + EPS)

    # Linear(dim -> mlp_dim), MXU fed at the weight dtype, f32 accumulation.
    h = jnp.dot(xn.astype(wk_ref.dtype), wk_ref[...],
                preferred_element_type=jnp.float32)

    # SiLU (bf16 on v6e/v7x with bf16 weights, f32 otherwise).
    h = h.astype(silu_dtype)
    h = h * jax.nn.sigmoid(h)

    # Linear(mlp_dim -> dim) + per-output-channel scale.
    y = jnp.dot(h.astype(wv_ref.dtype), wv_ref[...],
                preferred_element_type=jnp.float32)
    y = y * scale_ref[...].astype(jnp.float32)
    o_ref[...] = y.astype(o_ref.dtype)


def _mlp_chunked_kernel(x_ref, wk_ref, wv_ref, scale_ref, o_ref, acc_ref,
                        *, inv_dim, silu_dtype):
    # Grid = (row tiles, mlp_dim chunks); accumulate partial second matmuls.
    k = pl.program_id(1)

    @pl.when(k == 0)
    def _():
        acc_ref[...] = jnp.zeros_like(acc_ref)

    x = x_ref[...].astype(jnp.float32)
    ms = jnp.sum(x * x, axis=-1, keepdims=True) * inv_dim
    xn = x * jax.lax.rsqrt(ms + EPS)

    h = jnp.dot(xn.astype(wk_ref.dtype), wk_ref[...],
                preferred_element_type=jnp.float32)
    h = h.astype(silu_dtype)
    h = h * jax.nn.sigmoid(h)
    acc_ref[...] += jnp.dot(h.astype(wv_ref.dtype), wv_ref[...],
                            preferred_element_type=jnp.float32)

    @pl.when(k == pl.num_programs(1) - 1)
    def _():
        o_ref[...] = (acc_ref[...] * scale_ref[...].astype(jnp.float32)
                      ).astype(o_ref.dtype)


# ----------------------------------------------------------------------------
# Wrapper
# ----------------------------------------------------------------------------
def prepare_params(wk, wv, scale):
    """Pad weights/scale to lane multiples ONCE at parameter-setup time.

    Hoists the padding out of the per-forward path so non-aligned dims don't
    re-materialize the full weight matrices in HBM on every call.
    wk: (dim, mlp_dim)  wv: (mlp_dim, dim)  scale: (dim,)  (pre-transposed to (in, out)).
    """
    dim, mlp_dim = wk.shape
    dim_p, mlp_p = _round_up(dim, LANE), _round_up(mlp_dim, LANE)
    if (dim_p, mlp_p) != (dim, mlp_dim):
        wk = jnp.pad(wk, ((0, dim_p - dim), (0, mlp_p - mlp_dim)))
        wv = jnp.pad(wv, ((0, mlp_p - mlp_dim), (0, dim_p - dim)))
    if scale.shape[-1] != dim_p:
        scale = jnp.pad(scale.reshape(-1), (0, dim_p - scale.shape[-1]))
    return wk, wv, scale.reshape(1, dim_p)


@functools.partial(jax.jit,
                   static_argnames=("tm", "tk", "vmem_budget_bytes", "force_chunked"))
def mlp_block(x, wk, wv, scale, *, tm=None, tk=None,
              vmem_budget_bytes=None, force_chunked=False):
    """x: (B, T, dim); wk: (dim[_p], mlp_dim[_p]); wv: (mlp_dim[_p], dim[_p]); scale."""
    B, T, dim = x.shape
    N = B * T
    dim_p = _round_up(dim, LANE)

    # Accept raw or pre-padded (prepare_params) weights.
    if wk.shape[0] == dim:
        wk, wv, scale = prepare_params(wk, wv, scale)
    mlp_p = wk.shape[1]
    assert wk.shape == (dim_p, mlp_p) and mlp_p % LANE == 0
    assert wv.shape == (mlp_p, dim_p)
    if scale.ndim == 1:
        if scale.shape[0] != dim_p:
            scale = jnp.pad(scale, (0, dim_p - scale.shape[0]))
        scale = scale.reshape(1, dim_p)
    assert scale.shape == (1, dim_p)

    # Activations: token-major, lane-dense features. Only pad features when dim
    # is not a lane multiple; token rows are NOT padded (ragged last tile is
    # handled by Pallas's clipped boundary DMAs).
    x2 = x.reshape(N, dim)
    if dim_p != dim:
        x2 = jnp.pad(x2, ((0, 0), (0, dim_p - dim)))

    x_bytes = x.dtype.itemsize
    w_bytes = wk.dtype.itemsize
    silu_dtype = _silu_dtype(wv.dtype)
    silu_bytes = jnp.dtype(silu_dtype).itemsize

    # Generation-aware VMEM budget and scoped limit tied to it.
    capacity = _vmem_capacity_bytes()
    if vmem_budget_bytes is None:
        vmem_budget_bytes = (capacity * 3) // 4       # ~96 MiB (v5e/v6e) / ~48 MiB (v7x)
    vmem_limit = int(min(vmem_budget_bytes + 16 * MIB, capacity - 4 * MIB))

    # Resident weights are single-buffered (pl.Buffered(1)) -> 1x footprint.
    weight_resident = (2 * dim_p * mlp_p) * w_bytes + dim_p * 4
    use_chunked = bool(force_chunked) or weight_resident > (vmem_budget_bytes * 3) // 5

    if use_chunked:
        # --- mlp_dim-chunked path (weights too big to keep fully resident). ---
        if tk is None:
            tk_desired = max(LANE, (vmem_budget_bytes // 2) // (4 * dim_p * w_bytes))
        else:
            tk_desired = max(LANE, tk)
        tk = _largest_lane_divisor(mlp_p, min(tk_desired, mlp_p))  # tk | mlp_p (no ragged K chunk)
        n_k = mlp_p // tk
        resident = 2 * (2 * dim_p * tk) * w_bytes + dim_p * 4       # dbl-buffered wk/wv chunks + scale
        per_row = (2 * dim_p * x_bytes + 2 * dim_p * x_bytes        # x / out double buffers
                   + dim_p * 4                                      # f32 accumulator
                   + tk * (4 + silu_bytes))                         # h chunk (+ bf16 copy)
    else:
        n_k = 1
        resident = weight_resident
        per_row = (2 * dim_p * x_bytes + 2 * dim_p * x_bytes
                   + mlp_p * (4 + silu_bytes) + dim_p * 4)

    if tm is None:
        avail = max(vmem_budget_bytes - resident, per_row * SUBLANE)
        tm = min(8192, avail // per_row)
    tm = max(SUBLANE, _round_down(int(tm), SUBLANE))
    tm = min(tm, _round_up(N, SUBLANE))
    # Keep >= 2 row tiles when possible so the "parallel" axis feeds both
    # TensorCores on v7x (negligible cost on single-TC chips).
    if _cdiv(N, tm) < 2 and N > SUBLANE:
        tm = max(SUBLANE, _round_up(_cdiv(N, 2), SUBLANE))
    n_i = _cdiv(N, tm)

    flops = 4 * N * dim_p * mlp_p
    transcendentals = N * mlp_p + N
    bytes_accessed = (N * dim_p * x_bytes * 2
                      + 2 * dim_p * mlp_p * w_bytes * n_i * (1 if not use_chunked else 1)
                      + dim_p * 4)
    cost = pl.CostEstimate(flops=int(flops), transcendentals=int(transcendentals),
                           bytes_accessed=int(bytes_accessed))

    if not use_chunked:
        out = pl.pallas_call(
            functools.partial(_mlp_fused_kernel, inv_dim=1.0 / dim,
                              silu_dtype=silu_dtype),
            out_shape=jax.ShapeDtypeStruct((N, dim_p), x.dtype),
            grid_spec=pltpu.PrefetchScalarGridSpec(
                num_scalar_prefetch=0,
                grid=(n_i,),
                in_specs=[
                    pl.BlockSpec((tm, dim_p), lambda i: (i, 0)),
                    # Grid-invariant operands: fetched once, single-buffered.
                    pl.BlockSpec((dim_p, mlp_p), lambda i: (0, 0),
                                 pipeline_mode=pl.Buffered(1)),
                    pl.BlockSpec((mlp_p, dim_p), lambda i: (0, 0),
                                 pipeline_mode=pl.Buffered(1)),
                    pl.BlockSpec((1, dim_p), lambda i: (0, 0),
                                 pipeline_mode=pl.Buffered(1)),
                ],
                out_specs=pl.BlockSpec((tm, dim_p), lambda i: (i, 0)),
            ),
            compiler_params=pltpu.CompilerParams(
                dimension_semantics=("parallel",),
                vmem_limit_bytes=vmem_limit,
            ),
            cost_estimate=cost,
        )(x2, wk, wv, scale)
    else:
        out = pl.pallas_call(
            functools.partial(_mlp_chunked_kernel, inv_dim=1.0 / dim,
                              silu_dtype=silu_dtype),
            out_shape=jax.ShapeDtypeStruct((N, dim_p), x.dtype),
            grid_spec=pltpu.PrefetchScalarGridSpec(
                num_scalar_prefetch=0,
                grid=(n_i, n_k),
                in_specs=[
                    pl.BlockSpec((tm, dim_p), lambda i, k: (i, 0)),
                    pl.BlockSpec((dim_p, tk), lambda i, k: (0, k)),
                    pl.BlockSpec((tk, dim_p), lambda i, k: (k, 0)),
                    pl.BlockSpec((1, dim_p), lambda i, k: (0, 0),
                                 pipeline_mode=pl.Buffered(1)),
                ],
                out_specs=pl.BlockSpec((tm, dim_p), lambda i, k: (i, 0)),
                scratch_shapes=[pltpu.VMEM((tm, dim_p), jnp.float32)],
            ),
            compiler_params=pltpu.CompilerParams(
                dimension_semantics=("parallel", "arbitrary"),
                vmem_limit_bytes=vmem_limit,
            ),
            cost_estimate=cost,
        )(x2, wk, wv, scale)

    return out[:, :dim].reshape(B, T, dim)


# ----------------------------------------------------------------------------
# Pure-JAX reference (mirrors the kernel's compute dtypes)
# ----------------------------------------------------------------------------
def _reference(x, wk, wv, scale):
    cdt = wk.dtype
    sdt = _silu_dtype(wv.dtype)
    xf = x.astype(jnp.float32)
    xn = xf * jax.lax.rsqrt(jnp.mean(xf * xf, axis=-1, keepdims=True) + EPS)
    h = jnp.dot(xn.astype(cdt), wk, preferred_element_type=jnp.float32).astype(sdt)
    h = h * jax.nn.sigmoid(h)
    y = jnp.dot(h.astype(cdt), wv, preferred_element_type=jnp.float32)
    y = y * scale.reshape(-1).astype(jnp.float32)
    return y.astype(x.dtype)


if __name__ == "__main__":
    key = jax.random.PRNGKey(0)
    k1, k2, k3, k4 = jax.random.split(key, 4)

    # --- Case 1: lane-aligned dims, bf16 activations + bf16 weights ----------
    # (bf16 HBM streaming, bf16 SiLU on v6e/v7x, fully VMEM-resident weights).
    B, T, dim, mlp_dim = 2, 8, 128, 512
    x = jax.random.normal(k1, (B, T, dim), dtype=jnp.float32).astype(jnp.bfloat16)
    wk = (jax.random.normal(k2, (dim, mlp_dim), dtype=jnp.float32)
          / jnp.sqrt(dim)).astype(jnp.bfloat16)
    wv = (jax.random.normal(k3, (mlp_dim, dim), dtype=jnp.float32)
          / jnp.sqrt(mlp_dim)).astype(jnp.bfloat16)
    # Module uses zero-initialized scale (output would be all zeros at init);
    # use a random scale so the full compute path is exercised.
    scale = jax.random.normal(k4, (dim,), dtype=jnp.float32)

    out = jax.block_until_ready(mlp_block(x, wk, wv, scale))
    ref = _reference(x, wk, wv, scale)
    assert out.shape == (B, T, dim) and out.dtype == x.dtype
    assert jnp.allclose(out.astype(jnp.float32), ref.astype(jnp.float32),
                        atol=3e-2, rtol=3e-2)

    # --- Case 2: dim < 128 exercises feature padding (weights pre-padded once
    # --- via prepare_params), f32 path, small explicit row tile. -------------
    B2, T2, dim2, mlp2 = 2, 8, 32, 128
    xb = jax.random.normal(k1, (B2, T2, dim2), dtype=jnp.float32)
    wkb = jax.random.normal(k2, (dim2, mlp2), dtype=jnp.float32) / jnp.sqrt(dim2)
    wvb = jax.random.normal(k3, (mlp2, dim2), dtype=jnp.float32) / jnp.sqrt(mlp2)
    scb = jax.random.normal(k4, (dim2,), dtype=jnp.float32)
    wk_p, wv_p, sc_p = prepare_params(wkb, wvb, scb)   # hoisted out of the call path

    out2 = jax.block_until_ready(mlp_block(xb, wk_p, wv_p, sc_p, tm=8))
    ref2 = _reference(xb, wkb, wvb, scb)
    assert out2.shape == (B2, T2, dim2)
    assert jnp.allclose(out2, ref2, atol=2e-2, rtol=2e-2)

    # --- Case 3: mlp_dim-chunked accumulator path (used for weights too large
    # --- to stay VMEM-resident, esp. on v7x), plus a ragged last row tile. ---
    B3, T3, dim3, mlp3 = 4, 5, 128, 512       # N = 20 -> last (8-row) tile is ragged
    xc = jax.random.normal(k1, (B3, T3, dim3), dtype=jnp.float32)
    wkc = jax.random.normal(k2, (dim3, mlp3), dtype=jnp.float32) / jnp.sqrt(dim3)
    wvc = jax.random.normal(k3, (mlp3, dim3), dtype=jnp.float32) / jnp.sqrt(mlp3)
    scc = jax.random.normal(k4, (dim3,), dtype=jnp.float32)

    out3 = jax.block_until_ready(
        mlp_block(xc, wkc, wvc, scc, tm=8, tk=256, force_chunked=True))
    ref3 = _reference(xc, wkc, wvc, scc)
    assert out3.shape == (B3, T3, dim3)
    assert jnp.allclose(out3, ref3, atol=2e-2, rtol=2e-2)

    print("KERNEL_OK")
</pallas_src>

<mosaic_0001>
module attributes {stable_mosaic.version = 11 : i64} {
  func.func @_mlp_fused_kernel(%arg0: i32, %arg1: memref<8x128xbf16, #tpu.memory_space<vmem>>, %arg2: memref<128x512xbf16, #tpu.memory_space<vmem>>, %arg3: memref<512x128xbf16, #tpu.memory_space<vmem>>, %arg4: memref<1x128xf32, #tpu.memory_space<vmem>>, %arg5: memref<8x128xbf16, #tpu.memory_space<vmem>>) attributes {dimension_semantics = [#tpu.dimension_semantics<parallel>], iteration_bounds = array<i64: 2>, scalar_prefetch = 0 : i64, scratch_operands = 0 : i64, tpu.core_type = #tpu.core_type<tc>, window_params = [{transform_indices = @transform_0, window_bounds = array<i64: 8, 128>}, {pipeline_mode = #tpu.pipeline_mode<synchronous>, transform_indices = @transform_1, window_bounds = array<i64: 128, 512>}, {pipeline_mode = #tpu.pipeline_mode<synchronous>, transform_indices = @transform_2, window_bounds = array<i64: 512, 128>}, {pipeline_mode = #tpu.pipeline_mode<synchronous>, transform_indices = @transform_3, window_bounds = array<i64: 1, 128>}, {transform_indices = @transform_4, window_bounds = array<i64: 8, 128>}]} {
    %c0 = arith.constant 0 : index
    %c0_0 = arith.constant 0 : index
    %0 = vector.load %arg1[%c0, %c0_0] : memref<8x128xbf16, #tpu.memory_space<vmem>>, vector<8x128xbf16>
    %1 = arith.extf %0 : vector<8x128xbf16> to vector<8x128xf32>
    %2 = arith.mulf %1, %1 : vector<8x128xf32>
    %cst = arith.constant dense<0.000000e+00> : vector<8xf32>
    %3 = vector.multi_reduction <add>, %2, %cst [1] : vector<8x128xf32> to vector<8xf32>
    %4 = vector.shape_cast %3 : vector<8xf32> to vector<8x1xf32>
    %cst_1 = arith.constant 7.812500e-03 : f32
    %5 = vector.broadcast %cst_1 : f32 to vector<8x1xf32>
    %6 = arith.mulf %4, %5 : vector<8x1xf32>
    %cst_2 = arith.constant 9.99999997E-7 : f32
    %7 = vector.broadcast %cst_2 : f32 to vector<8x1xf32>
    %8 = arith.addf %6, %7 : vector<8x1xf32>
    %9 = math.rsqrt %8 : vector<8x1xf32>
    %10 = vector.broadcast %9 : vector<8x1xf32> to vector<8x128xf32>
    %11 = arith.mulf %1, %10 : vector<8x128xf32>
    %12 = arith.truncf %11 : vector<8x128xf32> to vector<8x128xbf16>
    %c0_3 = arith.constant 0 : index
    %c0_4 = arith.constant 0 : index
    %13 = vector.load %arg2[%c0_3, %c0_4] : memref<128x512xbf16, #tpu.memory_space<vmem>>, vector<128x512xbf16>
    %cst_5 = arith.constant dense<0.000000e+00> : vector<8x512xf32>
    %14 = tpu.matmul %12, %13, %cst_5 {dimension_numbers = #tpu.dot_dimension_numbers<[1], [0], [0], [1], [0, 0, 1, 1], [], []>} : vector<8x128xbf16>, vector<128x512xbf16>, vector<8x512xf32> -> vector<8x512xf32>
    %15 = arith.truncf %14 : vector<8x512xf32> to vector<8x512xbf16>
    %16 = arith.negf %15 : vector<8x512xbf16>
    %17 = math.exp %16 : vector<8x512xbf16>
    %cst_6 = arith.constant 1.000000e+00 : bf16
    %18 = vector.broadcast %cst_6 : bf16 to vector<8x512xbf16>
    %19 = arith.addf %18, %17 : vector<8x512xbf16>
    %20 = arith.divf %18, %19 : vector<8x512xbf16>
    %21 = arith.mulf %15, %20 : vector<8x512xbf16>
    %c0_7 = arith.constant 0 : index
    %c0_8 = arith.constant 0 : index
    %22 = vector.load %arg3[%c0_7, %c0_8] : memref<512x128xbf16, #tpu.memory_space<vmem>>, vector<512x128xbf16>
    %cst_9 = arith.constant dense<0.000000e+00> : vector<8x128xf32>
    %23 = tpu.matmul %21, %22, %cst_9 {dimension_numbers = #tpu.dot_dimension_numbers<[1], [0], [0], [1], [0, 0, 1, 1], [], []>} : vector<8x512xbf16>, vector<512x128xbf16>, vector<8x128xf32> -> vector<8x128xf32>
    %c0_10 = arith.constant 0 : index
    %c0_11 = arith.constant 0 : index
    %24 = vector.load %arg4[%c0_10, %c0_11] : memref<1x128xf32, #tpu.memory_space<vmem>>, vector<1x128xf32>
    %25 = vector.broadcast %24 : vector<1x128xf32> to vector<8x128xf32>
    %26 = arith.mulf %23, %25 : vector<8x128xf32>
    %27 = arith.truncf %26 : vector<8x128xf32> to vector<8x128xbf16>
    %c0_12 = arith.constant 0 : index
    %c0_13 = arith.constant 0 : index
    %28 = vector.load %arg5[%c0_12, %c0_13] : memref<8x128xbf16, #tpu.memory_space<vmem>>, vector<8x128xbf16>
    tpu.vector_store %arg5[%c0_12, %c0_13], %27 {strides = array<i32>} : memref<8x128xbf16, #tpu.memory_space<vmem>>, vector<8x128xbf16>,
    return
  }
  func.func @transform_0(%arg0: i32) -> (i32, i32) {
    %c0_i32 = arith.constant 0 : i32
    %c0_i32_0 = arith.constant 0 : i32
    return %arg0, %c0_i32 : i32, i32
  }
  func.func @transform_1(%arg0: i32) -> (i32, i32) {
    %c0_i32 = arith.constant 0 : i32
    %c0_i32_0 = arith.constant 0 : i32
    %c0_i32_1 = arith.constant 0 : i32
    return %c0_i32, %c0_i32_0 : i32, i32
  }
  func.func @transform_2(%arg0: i32) -> (i32, i32) {
    %c0_i32 = arith.constant 0 : i32
    %c0_i32_0 = arith.constant 0 : i32
    %c0_i32_1 = arith.constant 0 : i32
    return %c0_i32, %c0_i32_0 : i32, i32
  }
  func.func @transform_3(%arg0: i32) -> (i32, i32) {
    %c0_i32 = arith.constant 0 : i32
    %c0_i32_0 = arith.constant 0 : i32
    %c0_i32_1 = arith.constant 0 : i32
    return %c0_i32, %c0_i32_0 : i32, i32
  }
  func.func @transform_4(%arg0: i32) -> (i32, i32) {
    %c0_i32 = arith.constant 0 : i32
    %c0_i32_0 = arith.constant 0 : i32
    return %arg0, %c0_i32 : i32, i32
  }
}

</mosaic_0001>

<bundles_post_ra>
// kernel: mlp_block.1
= control target key start
LH: loop header
LB: loop body
LE: loop exit
PB: predicated region body
PF: predicated region fallthrough
CT: control target
= control target key end

     0   :  { %9 = vsyncpa [#allocation3], 0  ;;  %s1780_s0 = inlined_call_operand.hbm [shape: bf16[16,128], index: 0, kind: input, shape index: {}]   ;;  %s1781_s1 = inlined_call_operand.hbm [shape: bf16[128,512], index: 1, kind: input, shape index: {}]   ;;  %s1782_s2 = inlined_call_operand.hbm [shape: bf16[512,128], index: 2, kind: input, shape index: {}]   ;;  %s1783_s3 = inlined_call_operand.vmem [shape: f32[1,128], index: 3, kind: input, shape index: {}]   ;;  %s1784_s4 = inlined_call_operand.hbm [shape: bf16[16,128], index: 4, kind: output, shape index: {}]  }
   0x1   :  { %11 = vsyncpa [#allocation3 + $0x1], 0 }
   0x2   :  { %12 = vsyncpa [#allocation6], 0 }
   0x3   :  { %13 = vsyncpa [#allocation4], 0 }
   0x4   :  { %15 = vsyncpa [#allocation4 + $0x1], 0  ;;  %s1613_s15 = smov 0   ;;  %s1615_s16 = smov 0  }
   0x5   :  { %s1617_s17 = smov 0   ;;  %s1619_s18 = smov 0  }
   0x6 LB: > { %s152_s21 = sshll.u32 %s1781_s1, 4  ;;  %s1637_s22 = sadd.s32 4294967295, %s1579_s18   ;;  %s1579_s18 = sphi %s1619_s18, %s1795_s18   ;;  %s1575_s17 = sphi %s1617_s17, %s1794_s17   ;;  %s1571_s16 = sphi %s1615_s16, %s1793_s16   ;;  %s1567_s15 = sphi %s1613_s15, %s1792_s15   ;;  %s153_s21 = int_to_ptr.hbm [resolvable:$true] %s152_s21 }
   0x7   : > { %p993_p0 = scmp.ge.s32.totalorder %s1579_s18, 1  ;;  %p42_p1 = scmp.eq.s32.totalorder %s1637_s22, 0 }
   0x8   : > { %p141_p2 = scmp.lt.s32.totalorder %s1579_s18, 3  ;;  %s1581_s24 = smov [#allocation5]  }
   0x9   : > { %s154_s25 = sshll.u32 %s1581_s24, 4  ;;  %s166_s28 = sshll.u32 %s1782_s2, 4  ;;  %s155_s25 = int_to_ptr.vmem [resolvable:$true] %s154_s25  ;;  %s167_s28 = int_to_ptr.hbm [resolvable:$true] %s166_s28 }
   0xa   : > { %p1642_p3 = pnand %p993_p0, %p141_p2  ;;  %s1582_s29 = smov [#allocation7]  }
   0xb   : > { %s168_s30 = sshll.u32 %s1582_s29, 4  ;;  %s1583_s5 = smov 256   ;;  %s169_s30 = int_to_ptr.vmem [resolvable:$true] %s168_s30 }
   0xc   : > { %p1340_p4 = pneg %p1642_p3  ;;  %s1584_s6 = smov 16  }
   0xd   : > { %s1585_s7 = smov 64   ;;  %s1586_s8 = smov 4  }
   0xe   : > { %p1341_p6 = pnand %p1340_p4, %p42_p1  ;;  %s992_s9 = sadd.s32 4294967294, %s1579_s18  }
   0xf   : > { %s1656_s10 = sadd.s32 1, %s1579_s18   ;;  %s28_s12 = sadd.s32 1, %s1575_s17 }
  0x10   : > { %1343 = dma.hbm_to_vmem [thread:$0]  (!%p1341_p6), %s153_s21, 4096, %s155_s25, [#allocation6], %s1583_s5, %s1583_s5, %s1584_s6  }
  0x11   : > { %1346 = dma.hbm_to_vmem [thread:$0]  (!%p1341_p6), %s167_s28, 4096, %s169_s30, [#allocation6], %s1585_s7, %s1585_s7, %s1586_s8  }
  0x12   : > { %s25_s11 = ssub.s32 %s1579_s18, %s1656_s10  ;;  %p35_p8 = scmp.ne.s32.totalorder %s1575_s17, %s1571_s16 }
  0x13   : > { %p26_p7 = scmp.eq.s32.totalorder %s25_s11, 0  ;;  %p36_p9 = scmp.eq.s32.totalorder %s1579_s18, 0 }
  0x14   : > { %p41_p10 = scmp.ne.s32.totalorder %s1571_s16, %s1567_s15  ;;  %p128_p13 = scmp.eq.s32.totalorder %s1637_s22, 1 }
  0x15   : > { %s1667_s13 = scalar_select %p26_p7, %s1575_s17, %s28_s12  }
  0x16   : > { %p1669_p11 = por %p36_p9, %p35_p8  ;;  %p1675_p12 = por %p42_p1, %p41_p10 }
  0x17   : > { %p134_p0 = scmp.eq.s32.totalorder %s992_s9, 1  ;;  %p1357_p2 = scmp.lt.s32.totalorder %s1579_s18, 2 }
  0x18   : > { %s185_s20 = sand.u32 1, %s1575_s17   ;;  %p1682_p4 = por %p128_p13, %p35_p8 }
  0x19   : > { %p1686_p6 = por %p134_p0, %p41_p10  ;;  %s997_s25 = sshll.u32 %s185_s20, 2 }
  0x1a   : > { %s998_s26 = sshll.u32 %s1579_s18, 2  ;;  %s189_s30 = scalar_lea.vmem [#allocation2], %s997_s25 }
  0x1b   : > { %s193_s29 = scalar_lea.hbm %s1780_s0, %s998_s26  ;;  %s197_s5 = sshll.u32 %s189_s30, 4  ;;  %s198_s5 = int_to_ptr.vmem [resolvable:$true] %s197_s5 }
  0x1c   : > { %s195_s6 = sshll.u32 %s193_s29, 4  ;;  %p1696_p7 = pnand %p1357_p2, %p1669_p11  ;;  %s196_s6 = int_to_ptr.hbm [resolvable:$true] %s195_s6 }
  0x1d   : > { %s186_s8 = scalar_lea.sflag [#allocation3], %s185_s20  ;;  %s1479_s9 = sshra.s32 %s196_s6, 4  ;;  %s1480_s9 = int_to_ptr.hbm [resolvable:$true] %s1479_s9 }
  0x1e   : > { %s1481_s11 = scalar_lea.hbm %s1480_s9, 4  ;;  %p1483_p9 = pneg %p1696_p7 }
  0x1f   : > { %p1482_p8 = scmp.ne.s32.totalorder %s1480_s9, %s1481_s11  ;;  %s1486_s26 = scalar_lea.hbm %s1780_s0, 8 }
  0x20   : > { %p1487_p11 = scmp.lt.s32.totalorder %s1480_s9, %s1780_s0  ;;  %p1488_p0 = scmp.lt.s32.totalorder %s1486_s26, %s1481_s11 }
  0x21   : > { %p1484_p10 = pnand %p1483_p9, %p1482_p8 }
  0x22   : > { %p1489_p2 = por %p1488_p0, %p1487_p11 }
  0x23   : > { %p1485_p13 = pneg %p1484_p10 }
  0x25   : > { %p1490_p5 = pnand %p1489_p2, %p1485_p13 }
  0x27   : > { %1493 = shalt.err (!%p1490_p5)
}
  0x28   : > { %1350 = dma.hbm_to_vmem [thread:$0]  (!%p1696_p7), %s196_s6, 64, %s198_s5, %s186_s8  }
  0x29   : > { %206 = sbr.rel (%p1642_p3) target bundleno = 516 (0x204), region = 36  ;;  %s1713_s20 = sand.u32 (!%p1642_p3), 1, %s1571_s16  }
  0x2a   : > { %s1000_s28 = sshll.u32 (!%p1642_p3), %s1713_s20, 2  ;;  %s209_s29 = scalar_lea.sflag (!%p1642_p3), [#allocation3], %s1713_s20 }
  0x2b   : > { %s212_s30 = scalar_lea.vmem (!%p1642_p3), [#allocation2], %s1000_s28 }
  0x2e   : > { %1554 = dma.done.wait (%p1675_p12), %s209_s29, 64  }
  0x2f   : > { %1556 = vsyncadd (%p1675_p12), %s209_s29, 4294967232 }
  0x30   : > { %1558 = dma.done.wait (%p42_p1), [#allocation6], 8192  }
  0x31   : > { %1560 = vsyncadd (%p42_p1), [#allocation6], 4294959104  ;;  %v249_v0 = vld [vmem:[%s212_s30] sm:$0xf]  ;;  %v1118_v1 = vld [vmem:[#allocation5 + $0xe0] sm:$0xf] }
  0x32   : > { %v1294_v2 = vld [vmem:[#allocation5 + $0xec] sm:$0xf0]  ;;  %v1727_v3 = vunpack.c.l.bf16 %v249_v0  ;;  %v1292_v5 = vld [vmem:[#allocation5 + $0xe4] sm:$0xf]  ;;  %v1120_v6 = vld [vmem:[#allocation5 + $0xf0] sm:$0xf0] }
  0x33   : > { %v1119_v4 = vor.u32 %v1294_v2, %v1118_v1  ;;  %v1126_v7 = vld [vmem:[#allocation5 + $0xe8] sm:$0xf]  ;;  %v1123_v8 = vor.u32 %v1292_v5, %v1120_v6  ;;  %v1295_v9 = vld [vmem:[#allocation5 + $0xf4] sm:$0xf0]  ;;  %v1293_v10 = vld [vmem:[#allocation5 + $0xec] sm:$0xf] }
  0x34   : > { %v1128_v11 = vld [vmem:[#allocation5 + $0xf8] sm:$0xf0]  ;;  %v251_v12 = vmul.f32 %v1727_v3, %v1727_v3  ;;  %v1127_v13 = vor.u32 %v1295_v9, %v1126_v7  ;;  %v1102_v15 = vld [vmem:[#allocation5 + $0xc0] sm:$0xf]  ;;  %v1290_v16 = vld [vmem:[#allocation5 + $0xcc] sm:$0xf0] }
  0x35   : > { %460 = vmatpush.bf16.msra.mxu0 %v1119_v4  ;;  %v1131_v14 = vor.u32 %v1293_v10, %v1128_v11  ;;  %473 = vmatpush.bf16.msra.mxu1 %v1123_v8  ;;  %v1288_v17 = vld [vmem:[#allocation5 + $0xc4] sm:$0xf]  ;;  %v1103_v18 = vor.u32 %v1290_v16, %v1102_v15  ;;  %v1104_v19 = vld [vmem:[#allocation5 + $0xd0] sm:$0xf0]  ;;  %v1110_v20 = vld [vmem:[#allocation5 + $0xc8] sm:$0xf] }
  0x36   : > { %252 = vadd.xlane.f32.xlu0 %v251_v12  ;;  %486 = vmatpush.bf16.msra.mxu2 %v1127_v13  ;;  %v1291_v21 = vld [vmem:[#allocation5 + $0xd4] sm:$0xf0]  ;;  %v1107_v22 = vor.u32 %v1288_v17, %v1104_v19  ;;  %v1289_v24 = vld [vmem:[#allocation5 + $0xcc] sm:$0xf]  ;;  %v1112_v25 = vld [vmem:[#allocation5 + $0xd8] sm:$0xf0] }
  0x37   : > { %499 = vmatpush.bf16.msra.mxu3 %v1131_v14  ;;  %v1111_v23 = vor.u32 %v1291_v21, %v1110_v20  ;;  %v1115_v26 = vor.u32 %v1289_v24, %v1112_v25  ;;  %v1086_v27 = vld [vmem:[#allocation5 + $0xa0] sm:$0xf]  ;;  %v1286_v28 = vld [vmem:[#allocation5 + $0xac] sm:$0xf0]  ;;  %v1284_v29 = vld [vmem:[#allocation5 + $0xa4] sm:$0xf] }
  0x38   : > { %v1087_v30 = vor.u32 %v1286_v28, %v1086_v27  ;;  %v1088_v31 = vld [vmem:[#allocation5 + $0xb0] sm:$0xf0]  ;;  %v1094_v32 = vld [vmem:[#allocation5 + $0xa8] sm:$0xf]  ;;  %v1287_v33 = vld [vmem:[#allocation5 + $0xb4] sm:$0xf0] }
  0x39   : > { %461 = vmatpush.bf16.msra.mxu0 %v1103_v18  ;;  %474 = vmatpush.bf16.msra.mxu1 %v1107_v22  ;;  %v1091_v34 = vor.u32 %v1284_v29, %v1088_v31  ;;  %v1095_v35 = vor.u32 %v1287_v33, %v1094_v32  ;;  %v1285_v36 = vld [vmem:[#allocation5 + $0xac] sm:$0xf]  ;;  %v1096_v37 = vld [vmem:[#allocation5 + $0xb8] sm:$0xf0]  ;;  %v1070_v39 = vld [vmem:[#allocation5 + $0x80] sm:$0xf] }
  0x3a   : > { %487 = vmatpush.bf16.msra.mxu2 %v1111_v23  ;;  %v1099_v38 = vor.u32 %v1285_v36, %v1096_v37  ;;  %v1282_v40 = vld [vmem:[#allocation5 + $0x8c] sm:$0xf0]  ;;  %v1280_v41 = vld [vmem:[#allocation5 + $0x84] sm:$0xf]  ;;  %v1072_v43 = vld [vmem:[#allocation5 + $0x90] sm:$0xf0] }
  0x3b   : > { %500 = vmatpush.bf16.msra.mxu3 %v1115_v26  ;;  %v1071_v42 = vor.u32 %v1282_v40, %v1070_v39  ;;  %v1078_v44 = vld [vmem:[#allocation5 + $0x88] sm:$0xf]  ;;  %v1283_v45 = vld [vmem:[#allocation5 + $0x94] sm:$0xf0]  ;;  %v1075_v46 = vor.u32 %v1280_v41, %v1072_v43  ;;  %v1281_v48 = vld [vmem:[#allocation5 + $0x8c] sm:$0xf] }
  0x3c   : > { %v1079_v47 = vor.u32 %v1283_v45, %v1078_v44  ;;  %v1080_v49 = vld [vmem:[#allocation5 + $0x98] sm:$0xf0]  ;;  %v1054_v51 = vld [vmem:[#allocation5 + $0x60] sm:$0xf]  ;;  %v1278_v52 = vld [vmem:[#allocation5 + $0x6c] sm:$0xf0] }
  0x3d   : > { %462 = vmatpush.bf16.msra.mxu0 %v1087_v30  ;;  %475 = vmatpush.bf16.msra.mxu1 %v1091_v34  ;;  %v1083_v50 = vor.u32 %v1281_v48, %v1080_v49  ;;  %v1276_v53 = vld [vmem:[#allocation5 + $0x64] sm:$0xf]  ;;  %v1055_v54 = vor.u32 %v1278_v52, %v1054_v51  ;;  %v1056_v55 = vld [vmem:[#allocation5 + $0x70] sm:$0xf0]  ;;  %v1062_v56 = vld [vmem:[#allocation5 + $0x68] sm:$0xf] }
  0x3e   : > { %488 = vmatpush.bf16.msra.mxu2 %v1095_v35  ;;  %v1279_v57 = vld [vmem:[#allocation5 + $0x74] sm:$0xf0]  ;;  %v1059_v58 = vor.u32 %v1276_v53, %v1056_v55  ;;  %v1277_v60 = vld [vmem:[#allocation5 + $0x6c] sm:$0xf]  ;;  %v1064_v61 = vld [vmem:[#allocation5 + $0x78] sm:$0xf0] }
  0x3f   : > { %501 = vmatpush.bf16.msra.mxu3 %v1099_v38  ;;  %v1063_v59 = vor.u32 %v1279_v57, %v1062_v56  ;;  %v1067_v62 = vor.u32 %v1277_v60, %v1064_v61  ;;  %v1038_v63 = vld [vmem:[#allocation5 + $0x40] sm:$0xf]  ;;  %v1274_v0 = vld [vmem:[#allocation5 + $0x4c] sm:$0xf0]  ;;  %v1272_v1 = vld [vmem:[#allocation5 + $0x44] sm:$0xf] }
  0x40   : > { %v1039_v2 = vor.u32 %v1274_v0, %v1038_v63  ;;  %v1040_v4 = vld [vmem:[#allocation5 + $0x50] sm:$0xf0]  ;;  %v1046_v5 = vld [vmem:[#allocation5 + $0x48] sm:$0xf]  ;;  %v1275_v6 = vld [vmem:[#allocation5 + $0x54] sm:$0xf0] }
  0x41   : > { %463 = vmatpush.bf16.msra.mxu0 %v1071_v42  ;;  %476 = vmatpush.bf16.msra.mxu1 %v1075_v46  ;;  %v1043_v7 = vor.u32 %v1272_v1, %v1040_v4  ;;  %v1047_v8 = vor.u32 %v1275_v6, %v1046_v5  ;;  %v1273_v9 = vld [vmem:[#allocation5 + $0x4c] sm:$0xf]  ;;  %v1048_v10 = vld [vmem:[#allocation5 + $0x58] sm:$0xf0]  ;;  %v1022_v12 = vld [vmem:[#allocation5 + $0x20] sm:$0xf] }
  0x42   : > { %489 = vmatpush.bf16.msra.mxu2 %v1079_v47  ;;  %v1051_v11 = vor.u32 %v1273_v9, %v1048_v10  ;;  %v1270_v13 = vld [vmem:[#allocation5 + $0x2c] sm:$0xf0]  ;;  %v1268_v14 = vld [vmem:[#allocation5 + $0x24] sm:$0xf]  ;;  %v1024_v16 = vld [vmem:[#allocation5 + $0x30] sm:$0xf0] }
  0x43   : > { %502 = vmatpush.bf16.msra.mxu3 %v1083_v50  ;;  %v1023_v15 = vor.u32 %v1270_v13, %v1022_v12  ;;  %v1030_v17 = vld [vmem:[#allocation5 + $0x28] sm:$0xf]  ;;  %v1271_v18 = vld [vmem:[#allocation5 + $0x34] sm:$0xf0]  ;;  %v1027_v19 = vor.u32 %v1268_v14, %v1024_v16  ;;  %v1269_v21 = vld [vmem:[#allocation5 + $0x2c] sm:$0xf] }
  0x44   : > { %v1031_v20 = vor.u32 %v1271_v18, %v1030_v17  ;;  %v1032_v22 = vld [vmem:[#allocation5 + $0x38] sm:$0xf0]  ;;  %v1006_v24 = vld [vmem:[#allocation5] sm:$0xf]  ;;  %v1266_v25 = vld [vmem:[#allocation5 + $0xc] sm:$0xf0] }
  0x45   : > { %464 = vmatpush.bf16.msra.mxu0 %v1055_v54  ;;  %477 = vmatpush.bf16.msra.mxu1 %v1059_v58  ;;  %v1035_v23 = vor.u32 %v1269_v21, %v1032_v22  ;;  %v1264_v26 = vld [vmem:[#allocation5 + $0x4] sm:$0xf]  ;;  %v1007_v27 = vor.u32 %v1266_v25, %v1006_v24  ;;  %v1008_v28 = vld [vmem:[#allocation5 + $0x10] sm:$0xf0]  ;;  %v1014_v29 = vld [vmem:[#allocation5 + $0x8] sm:$0xf] }
  0x46   : > { %490 = vmatpush.bf16.msra.mxu2 %v1063_v59  ;;  %v1267_v30 = vld [vmem:[#allocation5 + $0x14] sm:$0xf0]  ;;  %v1011_v31 = vor.u32 %v1264_v26, %v1008_v28  ;;  %v1265_v33 = vld [vmem:[#allocation5 + $0xc] sm:$0xf]  ;;  %v1016_v34 = vld [vmem:[#allocation5 + $0x18] sm:$0xf0] }
  0x47   : > { %503 = vmatpush.bf16.msra.mxu3 %v1067_v62  ;;  %v1015_v32 = vor.u32 %v1267_v30, %v1014_v29  ;;  %v1019_v35 = vor.u32 %v1265_v33, %v1016_v34  ;;  %v1303_v48 = vld [vmem:[#allocation7 + $0x38] sm:$0xff]  ;;  %v1302_v50 = vld [vmem:[#allocation7 + $0x30] sm:$0xff]  ;;  %v1301_v54 = vld [vmem:[#allocation7 + $0x28] sm:$0xff]  ;;  %s1261_s23 = sshll.u32 %s1637_s22, 2  ;;  %s247_s9 = scalar_lea.vmem [#allocation8], %s1000_s28 }
  0x48   : > { %v1311_v49 = vld [vmem:[#allocation7 + $0x78] sm:$0xff]  ;;  %v1310_v51 = vld [vmem:[#allocation7 + $0x70] sm:$0xff]  ;;  %v1309_v55 = vld [vmem:[#allocation7 + $0x68] sm:$0xff]  ;;  %s898_s8 = scalar_lea.hbm %s1784_s4, %s1261_s23  ;;  %s900_s11 = sshll.u32 %s247_s9, 4  ;;  %s901_s11 = int_to_ptr.vmem [resolvable:$true] %s900_s11 }
  0x49   : > { %465 = vmatpush.bf16.msra.mxu0 %v1039_v2  ;;  %478 = vmatpush.bf16.msra.mxu1 %v1043_v7  ;;  %v1319_v52 = vld [vmem:[#allocation7 + $0xb8] sm:$0xff]  ;;  %v1326_v56 = vld [vmem:[#allocation7 + $0xf0] sm:$0xff]  ;;  %v1300_v57 = vld [vmem:[#allocation7 + $0x20] sm:$0xff]  ;;  %s902_s12 = sshll.u32 %s898_s8, 4  ;;  %s888_s22 = scalar_lea.sflag [#allocation4], %s1713_s20  ;;  %s903_s12 = int_to_ptr.hbm [resolvable:$true] %s902_s12 }
  0x4a   : > { %491 = vmatpush.bf16.msra.mxu2 %v1047_v8  ;;  %v1327_v53 = vld [vmem:[#allocation7 + $0xf8] sm:$0xff]  ;;  %v1308_v58 = vld [vmem:[#allocation7 + $0x60] sm:$0xff]  ;;  %v1317_v59 = vld [vmem:[#allocation7 + $0xa8] sm:$0xff]  ;;  %s1523_s25 = sshra.s32 %s903_s12, 4  ;;  %s1529_s28 = scalar_lea.hbm %s1784_s4, 8  ;;  %s1524_s25 = int_to_ptr.hbm [resolvable:$true] %s1523_s25 }
  0x4b   : > { %504 = vmatpush.bf16.msra.mxu3 %v1051_v11  ;;  %v1325_v60 = vld [vmem:[#allocation7 + $0xe8] sm:$0xff]  ;;  %v1299_v61 = vld [vmem:[#allocation7 + $0x18] sm:$0xff]  ;;  %v1316_v63 = vld [vmem:[#allocation7 + $0xa0] sm:$0xff]  ;;  %s1525_s26 = scalar_lea.hbm %s1524_s25, 4  ;;  %p1530_p12 = scmp.lt.s32.totalorder %s1524_s25, %s1784_s4 }
  0x4c   : > { %v1307_v62 = vld [vmem:[#allocation7 + $0x58] sm:$0xff]  ;;  %v1324_v0 = vld [vmem:[#allocation7 + $0xe0] sm:$0xff]  ;;  %v1298_v1 = vld [vmem:[#allocation7 + $0x10] sm:$0xff]  ;;  %p1526_p1 = scmp.ne.s32.totalorder %s1524_s25, %s1525_s26  ;;  %p1531_p7 = scmp.lt.s32.totalorder %s1529_s28, %s1525_s26 }
  0x4d   : > { %466 = vmatpush.bf16.msra.mxu0 %v1023_v15  ;;  %479 = vmatpush.bf16.msra.mxu1 %v1027_v19  ;;  %v1306_v2 = vld [vmem:[#allocation7 + $0x50] sm:$0xff]  ;;  %v1315_v6 = vld [vmem:[#allocation7 + $0x98] sm:$0xff]  ;;  %v1297_v9 = vld [vmem:[#allocation7 + $0x8] sm:$0xff] }
  0x4e   : > { %492 = vmatpush.bf16.msra.mxu2 %v1031_v20  ;;  %v1323_v7 = vld [vmem:[#allocation7 + $0xd8] sm:$0xff]  ;;  %v1305_v10 = vld [vmem:[#allocation7 + $0x48] sm:$0xff]  ;;  %v1314_v12 = vld [vmem:[#allocation7 + $0x90] sm:$0xff]  ;;  %p1527_p3 = pnand %p1526_p1, %p1682_p4  ;;  %p1532_p8 = por %p1531_p7, %p1530_p12 }
  0x4f   : > { %505 = vmatpush.bf16.msra.mxu3 %v1035_v23  ;;  %v1322_v13 = vld [vmem:[#allocation7 + $0xd0] sm:$0xff]  ;;  %v1296_v16 = vld [vmem:[#allocation7] sm:$0xff]  ;;  %v1313_v25 = vld [vmem:[#allocation7 + $0x88] sm:$0xff] }
  0x50   : > { %v1304_v17 = vld [vmem:[#allocation7 + $0x40] sm:$0xff]  ;;  %v1321_v26 = vld [vmem:[#allocation7 + $0xc8] sm:$0xff]  ;;  %p1528_p5 = pneg %p1527_p3 }
  0x51   : > { %467 = vmatpush.bf16.msra.mxu0 %v1007_v27  ;;  %480 = vmatpush.bf16.msra.mxu1 %v1011_v31  ;;  %v1312_v30 = vld [vmem:[#allocation7 + $0x80] sm:$0xff] }
  0x52   : > { %493 = vmatpush.bf16.msra.mxu2 %v1015_v32  ;;  %v1320_v31 = vld [vmem:[#allocation7 + $0xc0] sm:$0xff]  ;;  %p1533_p9 = pnand %p1532_p8, %p1528_p5 }
  0x53   : > { %506 = vmatpush.bf16.msra.mxu3 %v1019_v35 }
  0x55   : > { %828 = vmatpush.bf16.msrb.mxu0 %v1303_v48  ;;  %841 = vmatpush.bf16.msrb.mxu1 %v1311_v49 }
  0x56   : > { %854 = vmatpush.bf16.msrb.mxu2 %v1319_v52 }
  0x57   : > { %867 = vmatpush.bf16.msrb.mxu3 %v1327_v53 }
  0x59   : > { %829 = vmatpush.bf16.msrb.mxu0 %v1302_v50  ;;  %842 = vmatpush.bf16.msrb.mxu1 %v1310_v51 }
  0x5b   : > { %868 = vmatpush.bf16.msrb.mxu3 %v1326_v56 }
  0x5d   : > { %830 = vmatpush.bf16.msrb.mxu0 %v1301_v54  ;;  %843 = vmatpush.bf16.msrb.mxu1 %v1309_v55  ;;  %v1587_v54 = vmov 1065369472  }
  0x5e   : > { %v540_v55 = vunpack.c.h.bf16 %v1587_v54 }
  0x5f   : > { %869 = vmatpush.bf16.msrb.mxu3 %v1325_v60 }
  0x61   : > { %831 = vmatpush.bf16.msrb.mxu0 %v1300_v57  ;;  %844 = vmatpush.bf16.msrb.mxu1 %v1308_v58 }
  0x63   : > { %870 = vmatpush.bf16.msrb.mxu3 %v1324_v0 }
  0x65   : > { %832 = vmatpush.bf16.msrb.mxu0 %v1299_v61  ;;  %845 = vmatpush.bf16.msrb.mxu1 %v1307_v62 }
  0x67   : > { %871 = vmatpush.bf16.msrb.mxu3 %v1323_v7 }
  0x69   : > { %833 = vmatpush.bf16.msrb.mxu0 %v1298_v1  ;;  %846 = vmatpush.bf16.msrb.mxu1 %v1306_v2 }
  0x6b   : > { %872 = vmatpush.bf16.msrb.mxu3 %v1322_v13 }
  0x6d   : > { %834 = vmatpush.bf16.msrb.mxu0 %v1297_v9  ;;  %847 = vmatpush.bf16.msrb.mxu1 %v1305_v10 }
  0x6f   : > { %873 = vmatpush.bf16.msrb.mxu3 %v1321_v26 }
  0x71   : > { %835 = vmatpush.bf16.msrb.mxu0 %v1296_v16  ;;  %848 = vmatpush.bf16.msrb.mxu1 %v1304_v17 }
  0x73   : > { %874 = vmatpush.bf16.msrb.mxu3 %v1320_v31 }
  0xa9   : > { %v253_v36 = vpop.xlane.xlu0 %252 }
  0xaa   : > { %v254_v37 = vmul.f32 0.0078125, %v253_v36 }
  0xac   : > { %v255_v38 = vadd.f32 1e-06, %v254_v37 }
  0xae   : > { %1401 = vrsqrt.f32 %v255_v38  ;;  %vm262_vm1 = vweird.f32 %v255_v38 }
  0xb4   : > { %v1402_v39 = vpop.eup %1401 }
  0xb5   : > { %v257_v40 = vmul.f32 %v1402_v39, %v255_v38  ;;  %vm263_vm0 = vweird.f32 %v1402_v39 }
  0xb6   : > { %vm264_vm2 = vmor %vm262_vm1, %vm263_vm0 }
  0xb7   : > { %v258_v41 = vmul.f32 %v1402_v39, %v257_v40 }
  0xb9   : > { %v259_v42 = vmul.f32 0.5, %v258_v41 }
  0xbb   : > { %v260_v43 = vsub.f32 1.5, %v259_v42 }
  0xbd   : > { %v261_v44 = vmul.f32 %v1402_v39, %v260_v43 }
  0xbf   : > { %v265_v45 = vsel %vm264_vm2, %v1402_v39, %v261_v44 }
  0xc0   : > { %v266_v46 = vmul.f32 %v265_v45, %v1727_v3  ;;  %v1318_v3 = vld [vmem:[#allocation7 + $0xb0] sm:$0xff] }
  0xc1   : > { %855 = vmatpush.bf16.msrb.mxu2 %v1318_v3  ;;  %v541_v3 = vunpack.c.l.bf16 %v1587_v54 }
  0xc2   : > { %v267_v47 = vpack.c.bf16 %v266_v46, %v266_v46 }
  0xc4   : > { %468 = vmatmul.bf16.vlgmr.msra.gmra.mxu0 %v267_v47  ;;  %481 = vmatmul.bf16.vlgmr.msra.gmra.mxu1 %v267_v47 }
  0xc5   : > { %494 = vmatmul.bf16.vlgmr.msra.gmra.mxu2 %v267_v47  ;;  %507 = vmatmul.bf16.vlgmr.msra.gmra.mxu3 %v267_v47 }
  0xc6   : > { %856 = vmatpush.bf16.msrb.mxu2 %v1317_v59 }
  0xca   : > { %857 = vmatpush.bf16.msrb.mxu2 %v1316_v63 }
  0xce   : > { %858 = vmatpush.bf16.msrb.mxu2 %v1315_v6 }
  0xd2   : > { %859 = vmatpush.bf16.msrb.mxu2 %v1314_v12 }
  0xd6   : > { %860 = vmatpush.bf16.msrb.mxu2 %v1313_v25 }
  0xda   : > { %861 = vmatpush.bf16.msrb.mxu2 %v1312_v30 }
 0x141   : > { %v469_v4 = vpop.f32.mrf.mxu0  ;;  %v482_v5 = vpop.f32.mrf.mxu1 }
 0x142   : > { %v1732_v8 = vpack.c.bf16 %v482_v5, %v469_v4 }
 0x144   : > { %v514_v11 = vxor.u32 2147516416, %v1732_v8  ;;  %v556_v63 = vunpack.c.l.bf16 %v1732_v8  ;;  %v557_v0 = vunpack.c.h.bf16 %v1732_v8 }
 0x146   : > { %v516_v14 = vunpack.c.l.bf16 %v514_v11  ;;  %v517_v15 = vunpack.c.h.bf16 %v514_v11 }
 0x148   : > { %v520_v18 = vmul.f32 1.442695, %v516_v14  ;;  %v522_v19 = vmul.f32 1.442695, %v517_v15  ;;  %v495_v20 = vpop.f32.mrf.mxu2  ;;  %v508_v21 = vpop.f32.mrf.mxu3 }
 0x149   : > { %v1735_v22 = vpack.c.bf16 %v508_v21, %v495_v20  ;;  %v471_v23 = vpop.f32.mrf.mxu0  ;;  %v484_v24 = vpop.f32.mrf.mxu1 }
 0x14a   : > { %1403 = vpow2.f32 %v520_v18 }
 0x14b   : > { %1405 = vpow2.f32 %v522_v19  ;;  %v515_v27 = vxor.u32 2147516416, %v1735_v22  ;;  %v558_v14 = vunpack.c.l.bf16 %v1735_v22  ;;  %v559_v15 = vunpack.c.h.bf16 %v1735_v22  ;;  %v1400_v22 = vld [vmem:[%s1783_s3] ss:$0 sm:$0xff] }
 0x14d   : > { %v518_v28 = vunpack.c.l.bf16 %v515_v27  ;;  %v519_v29 = vunpack.c.h.bf16 %v515_v27 }
 0x14f   : > { %v524_v32 = vmul.f32 1.442695, %v518_v28  ;;  %v526_v33 = vmul.f32 1.442695, %v519_v29 }
 0x150   : > { %v1404_v34 = vpop.eup %1403  ;;  %v497_v35 = vpop.f32.mrf.mxu2 }
 0x151   : > { %v510_v36 = vpop.f32.mrf.mxu3  ;;  %v1406_v37 = vpop.eup %1405  ;;  %1407 = vpow2.f32 %v524_v32 }
 0x152   : > { %v528_v38 = vpack.c.bf16 %v1406_v37, %v1404_v34  ;;  %1409 = vpow2.f32 %v526_v33 }
 0x154   : > { %v530_v39 = vunpack.c.l.bf16 %v528_v38  ;;  %v531_v40 = vunpack.c.h.bf16 %v528_v38 }
 0x156   : > { %v534_v41 = vadd.f32 1.0, %v530_v39  ;;  %v535_v42 = vadd.f32 1.0, %v531_v40 }
 0x157   : > { %v1408_v43 = vpop.eup %1407 }
 0x158   : > { %v1410_v44 = vpop.eup %1409  ;;  %v538_v45 = vpack.c.bf16 %v535_v42, %v534_v41 }
 0x159   : > { %v529_v46 = vpack.c.bf16 %v1410_v44, %v1408_v43 }
 0x15a   : > { %v542_v47 = vunpack.c.h.bf16 %v538_v45  ;;  %v543_v48 = vunpack.c.l.bf16 %v538_v45 }
 0x15b   : > { %v532_v49 = vunpack.c.l.bf16 %v529_v46  ;;  %v533_v50 = vunpack.c.h.bf16 %v529_v46 }
 0x15c   : > { %1411 = vrcp.f32 %v542_v47 }
 0x15d   : > { %v536_v51 = vadd.f32 1.0, %v532_v49  ;;  %v537_v52 = vadd.f32 1.0, %v533_v50  ;;  %1413 = vrcp.f32 %v543_v48 }
 0x15f   : > { %v539_v53 = vpack.c.bf16 %v537_v52, %v536_v51 }
 0x161   : > { %v549_v56 = vunpack.c.h.bf16 %v539_v53  ;;  %v550_v57 = vunpack.c.l.bf16 %v539_v53 }
 0x162   : > { %v1412_v58 = vpop.eup %1411 }
 0x163   : > { %v1414_v59 = vpop.eup %1413  ;;  %v545_v60 = vmul.f32 %v1412_v58, %v540_v55  ;;  %1415 = vrcp.f32 %v549_v56 }
 0x164   : > { %v547_v61 = vmul.f32 %v1414_v59, %v541_v3  ;;  %1417 = vrcp.f32 %v550_v57 }
 0x166   : > { %v548_v62 = vpack.c.bf16 %v545_v60, %v547_v61 }
 0x168   : > { %v560_v1 = vunpack.c.l.bf16 %v548_v62  ;;  %v561_v2 = vunpack.c.h.bf16 %v548_v62 }
 0x169   : > { %v1416_v4 = vpop.eup %1415 }
 0x16a   : > { %v1418_v5 = vpop.eup %1417  ;;  %v564_v6 = vmul.f32 %v560_v1, %v556_v63  ;;  %v565_v7 = vmul.f32 %v561_v2, %v557_v0  ;;  %v552_v9 = vmul.f32 %v1416_v4, %v540_v55 }
 0x16b   : > { %v554_v10 = vmul.f32 %v1418_v5, %v541_v3 }
 0x16c   : > { %v568_v11 = vpack.c.bf16 %v564_v6, %v564_v6  ;;  %v569_v12 = vpack.c.bf16 %v565_v7, %v565_v7 }
 0x16d   : > { %v555_v13 = vpack.c.bf16 %v552_v9, %v554_v10 }
 0x16e   : > { %836 = vmatmul.bf16.vlgmr.msrb.gmra.mxu0 %v568_v11  ;;  %849 = vmatmul.bf16.vlgmr.msrb.gmra.mxu1 %v569_v12 }
 0x16f   : > { %v562_v16 = vunpack.c.l.bf16 %v555_v13  ;;  %v563_v8 = vunpack.c.h.bf16 %v555_v13 }
 0x171   : > { %v566_v17 = vmul.f32 %v562_v16, %v558_v14  ;;  %v567_v18 = vmul.f32 %v563_v8, %v559_v15 }
 0x173   : > { %v570_v19 = vpack.c.bf16 %v566_v17, %v566_v17  ;;  %v571_v20 = vpack.c.bf16 %v567_v18, %v567_v18 }
 0x175   : > { %862 = vmatmul.bf16.vlgmr.msrb.gmra.mxu2 %v570_v19  ;;  %875 = vmatmul.bf16.vlgmr.msrb.gmra.mxu3 %v571_v20 }
 0x1eb   : > { %v837_v21 = vpop.f32.mrf.mxu0  ;;  %v850_v23 = vpop.f32.mrf.mxu1 }
 0x1ec   : > { %v851_v26 = vadd.f32 %v850_v23, %v837_v21 }
 0x1f3   : > { %v839_v24 = vpop.f32.mrf.mxu0  ;;  %v852_v25 = vpop.f32.mrf.mxu1 }
 0x1f8   : > { %v863_v27 = vpop.f32.mrf.mxu2  ;;  %v876_v28 = vpop.f32.mrf.mxu3 }
 0x1f9   : > { %v864_v29 = vadd.f32 %v863_v27, %v851_v26 }
 0x1fb   : > { %v877_v30 = vadd.f32 %v876_v28, %v864_v29 }
 0x1fd   : > { %v884_v31 = vmul.f32 %v1400_v22, %v877_v30 }
 0x1ff   : > { %v885_v32 = vpack.c.bf16 %v884_v31, %v884_v31 }
 0x200   : > { %v865_v33 = vpop.f32.mrf.mxu2  ;;  %v878_v34 = vpop.f32.mrf.mxu3 }
 0x201   : > { %886 = vst [vmem:[%s247_s9] sm:$0xf] %v885_v32 }
 0x202   : > { %1536 = shalt.err (!%p1533_p9)
}
 0x203   : > { %1338 = dma.vmem_to_hbm [thread:$0]  (%p1682_p4), %s901_s11, 64, %s903_s12, %s888_s22  }
 0x204 PF: > { %s914_s20 = sand.u32 1, %s1567_s15   ;;  %p1791_p10 = scmp.ge.s32.totalorder %s1579_s18, 2 }
 0x205   : > { %s915_s23 = scalar_lea.sflag [#allocation4], %s914_s20 }
 0x206   : > { %p1352_p13 = pnand %p1791_p10, %p1686_p6 }
 0x208   : > { %p1353_p11 = pneg %p1352_p13 }
 0x20a   : > { %1562 = dma.done.wait (%p1353_p11), %s915_s23, 64  }
 0x20b   : > { %1564 = vsyncadd (%p1353_p11), %s915_s23, 4294967232  ;;  %p18_p0 = scmp.ge.s32.totalorder %s1656_s10, 4   ;;  %s1792_s15 = smov %s1571_s16 }
 0x20c   : > { %s1793_s16 = smov %s1575_s17  ;;  %s1794_s17 = smov %s1667_s13 }
 0x20d   : > { %s1795_s18 = smov %s1656_s10  ;;  %20 = sbr.rel (!%p18_p0) target bundleno = 6 (0x6), region = 89 }
 0x212   :  { %921 = vsyncpa [#allocation3], 1 }
 0x213   :  { %923 = vsyncpa [#allocation3 + $0x1], 1 }
 0x214   :  { %924 = vsyncpa [#allocation6], 1 }
 0x215   :  { %925 = vsyncpa [#allocation4], 1 }
 0x216   :  { %927 = vsyncpa [#allocation4 + $0x1], 1 }

</bundles_post_ra>
